<compile_context>
chip_gen: v7x
topology: tpu7x:2x2x1
jax: 0.10.0
libtpu: 0.0.40
codegen_flags: <defaults>
</compile_context>

<pallas_src>
import functools
import math

import jax
import jax.numpy as jnp
from jax.experimental import pallas as pl
from jax.experimental.pallas import tpu as pltpu


# --------------------------------------------------------------------------
# Kernel: o[s_blk, :] = x[s_blk, :] + tile(pe[s_blk, :], batch)  (lane tile)
# --------------------------------------------------------------------------
def posenc_add_kernel(x_ref, pe_ref, o_ref, *, batch):
    # x_ref : (ts, B*D)   pe_ref : (ts, D)   o_ref : (ts, B*D)
    pe = pe_ref[...]
    if batch > 1:
        pe = jnp.tile(pe, (1, batch))            # lane-axis replication in VMEM
    o_ref[...] = x_ref[...] + pe                 # single lane-dense store


# --------------------------------------------------------------------------
# Positional-encoding table (same formula as the PyTorch buffer), computed once
# on the wrapper side (hoisted invariant).
# --------------------------------------------------------------------------
def make_pe_table(max_len, d_model, dtype=jnp.float32):
    assert d_model % 2 == 0, "d_model must be even (matches torch module)"
    position = jnp.arange(max_len, dtype=jnp.float32)[:, None]            # (L, 1)
    div_term = jnp.exp(
        jnp.arange(0, d_model, 2, dtype=jnp.float32)
        * (-math.log(10000.0) / d_model))                                 # (D/2,)
    ang = position * div_term                                             # (L, D/2)
    pe = jnp.zeros((max_len, d_model), jnp.float32)
    pe = pe.at[:, 0::2].set(jnp.sin(ang))
    pe = pe.at[:, 1::2].set(jnp.cos(ang))
    return pe.astype(dtype)                                               # (L, D)


def _pick_seq_tile(S, bytes_per_row, vmem_budget=8 << 20):
    """Largest multiple-of-8 divisor of S whose block fits the VMEM budget."""
    max_rows = max(8, vmem_budget // max(bytes_per_row, 1))
    best = None
    cand = 8
    while cand <= min(S, 4096):
        if S % cand == 0 and cand <= max_rows:
            best = cand
        cand += 8
    return best if best is not None else S      # full-extent block is always legal


@jax.jit
def positional_encoding_forward(x, pe_table):
    """Pallas equivalent of PositionalEncoding.forward(x) in eval mode.

    x        : (S, B, D)  seq-first, like the PyTorch module
    pe_table : (max_len, D) precomputed sin/cos table
    """
    S, B, D = x.shape
    dtype = x.dtype

    pe_s = pe_table[:S].astype(dtype)            # (S, D) — hoisted slice
    x2d = x.reshape(S, B * D)                    # free contiguous view

    # Per seq row (x tile + pe tile + out tile), double-buffered by the pipeline.
    itemsize = jnp.dtype(dtype).itemsize
    bytes_per_row = 2 * (2 * B * D + D) * itemsize
    ts = _pick_seq_tile(S, bytes_per_row)
    grid = (S // ts,) if S % ts == 0 else (1,)
    if S % ts != 0:
        ts = S

    out2d = pl.pallas_call(
        functools.partial(posenc_add_kernel, batch=B),
        out_shape=jax.ShapeDtypeStruct((S, B * D), dtype),
        grid_spec=pltpu.PrefetchScalarGridSpec(
            num_scalar_prefetch=0,
            grid=grid,
            in_specs=[
                pl.BlockSpec((ts, B * D), lambda i: (i, 0)),   # x slab tile
                pl.BlockSpec((ts, D), lambda i: (i, 0)),       # pe tile
            ],
            out_specs=pl.BlockSpec((ts, B * D), lambda i: (i, 0)),
        ),
        compiler_params=pltpu.CompilerParams(
            dimension_semantics=("parallel",)),   # independent seq blocks
    )(x2d, pe_s)

    # nn.Dropout in eval mode is the identity.
    return out2d.reshape(S, B, D)


# --------------------------------------------------------------------------
# Pure-JAX reference mirroring the PyTorch forward (eval mode).
# --------------------------------------------------------------------------
def ref_forward(x, pe_table):
    S = x.shape[0]
    return x + pe_table[:S][:, None, :].astype(x.dtype)


if __name__ == "__main__":
    # Small shapes consistent with the module: seq-first (S, B, D).
    S, B, D = 8, 2, 32
    max_len = 64

    key = jax.random.PRNGKey(0)
    x = jax.random.normal(key, (S, B, D), dtype=jnp.float32)

    pe_table = make_pe_table(max_len, D, dtype=jnp.float32)

    out = positional_encoding_forward(x, pe_table)
    jax.block_until_ready(out)

    expected = ref_forward(x, pe_table)
    assert out.shape == (S, B, D)
    assert jnp.allclose(out, expected, rtol=1e-5, atol=1e-5), "mismatch vs reference"

    print("KERNEL_OK")
</pallas_src>

<mosaic_0001>
module attributes {stable_mosaic.version = 11 : i64} {
  func.func @posenc_add_kernel(%arg0: i32, %arg1: memref<8x64xf32, #tpu.memory_space<vmem>>, %arg2: memref<8x32xf32, #tpu.memory_space<vmem>>, %arg3: memref<8x64xf32, #tpu.memory_space<vmem>>) attributes {dimension_semantics = [#tpu.dimension_semantics<parallel>], iteration_bounds = array<i64: 1>, scalar_prefetch = 0 : i64, scratch_operands = 0 : i64, tpu.core_type = #tpu.core_type<tc>, window_params = [{transform_indices = @transform_0, window_bounds = array<i64: 8, 64>}, {transform_indices = @transform_1, window_bounds = array<i64: 8, 32>}, {transform_indices = @transform_2, window_bounds = array<i64: 8, 64>}]} {
    %c0 = arith.constant 0 : index
    %c0_0 = arith.constant 0 : index
    %0 = vector.load %arg2[%c0, %c0_0] : memref<8x32xf32, #tpu.memory_space<vmem>>, vector<8x32xf32>
    %1 = tpu.concatenate %0, %0 in 1 : vector<8x32xf32>, vector<8x32xf32> -> vector<8x64xf32>
    %c0_1 = arith.constant 0 : index
    %c0_2 = arith.constant 0 : index
    %2 = vector.load %arg1[%c0_1, %c0_2] : memref<8x64xf32, #tpu.memory_space<vmem>>, vector<8x64xf32>
    %3 = arith.addf %2, %1 : vector<8x64xf32>
    %c0_3 = arith.constant 0 : index
    %c0_4 = arith.constant 0 : index
    %4 = vector.load %arg3[%c0_3, %c0_4] : memref<8x64xf32, #tpu.memory_space<vmem>>, vector<8x64xf32>
    tpu.vector_store %arg3[%c0_3, %c0_4], %3 {strides = array<i32>} : memref<8x64xf32, #tpu.memory_space<vmem>>, vector<8x64xf32>,
    return
  }
  func.func @transform_0(%arg0: i32) -> (i32, i32) {
    %c0_i32 = arith.constant 0 : i32
    %c0_i32_0 = arith.constant 0 : i32
    return %arg0, %c0_i32 : i32, i32
  }
  func.func @transform_1(%arg0: i32) -> (i32, i32) {
    %c0_i32 = arith.constant 0 : i32
    %c0_i32_0 = arith.constant 0 : i32
    return %arg0, %c0_i32 : i32, i32
  }
  func.func @transform_2(%arg0: i32) -> (i32, i32) {
    %c0_i32 = arith.constant 0 : i32
    %c0_i32_0 = arith.constant 0 : i32
    return %arg0, %c0_i32 : i32, i32
  }
}

</mosaic_0001>

<bundles_post_ra>
// kernel: positional_encoding_forward.1
= control target key start
LH: loop header
LB: loop body
LE: loop exit
PB: predicated region body
PF: predicated region fallthrough
CT: control target
= control target key end

     0   :  { %s27_s11 = smov 32   ;;  %vm16_vm0 = vcmask 261120   ;;  %vm20_vm1 = vcmask 523264   ;;  %s52_s1 = inlined_call_operand.vmem [shape: f32[8,32], index: 1, kind: input, shape index: {}]   ;;  %s53_s0 = inlined_call_operand.vmem [shape: f32[8,64], index: 0, kind: input, shape index: {}]   ;;  %s54_s2 = inlined_call_operand.vmem [shape: f32[8,64], index: 2, kind: output, shape index: {}]  }
   0x1   :  { %v11_v0 = vld [vmem:[%s52_s1] sm:$0xff] }
   0x2   :  { %13 = vrot.lane.b32.xlu0 %v11_v0, %s27_s11  ;;  %v18_v1 = vld [vmem:[%s53_s0] sm:$0xff] }
  0x74   :  { %v14_v2 = vpop.permute.xlu0 %13 }
  0x75   :  { %v17_v3 = vsel %vm16_vm0, %v11_v0, %v14_v2 }
  0x76   :  { %v19_v4 = vadd.f32 %v18_v1, %v17_v3 }
  0x78   :  { %21 = vst.msk [vmem:[%s54_s2] sm:$0xff] %vm20_vm1, %v19_v4 }

</bundles_post_ra>
